<compile_context>
chip_gen: v7x
topology: tpu7x:2x2x1
jax: 0.10.0
libtpu: 0.0.40
codegen_flags: <defaults>
</compile_context>

<pallas_src>
import math

import numpy as np

import jax
import jax.numpy as jnp
from jax.experimental import pallas as pl
from jax.experimental.pallas import tpu as pltpu


def _diffusion_embedding_kernel(x_ref, freq_ref, out_ref):
    # x_ref:    (TB, 1)        float32  (batch on sublanes)
    # freq_ref: (1, half_dim)  float32  (same block every grid step)
    # out_ref:  (TB, dim)      float32  (dim on lanes; dim = 2 * half_dim)
    half_dim = freq_ref.shape[-1]
    arg = x_ref[...] * freq_ref[...]          # (TB,1)*(1,half) -> (TB, half)
    # TODO(synk): sin/cos lower to VPU range-reduction + polynomial (~20-30
    # VALU ops/elem) -> VALU-bound on v6e/v7x at large B; share the range
    # reduction between sin and cos or fuse into the downstream MXU kernel.
    out_ref[:, :half_dim] = jnp.sin(arg)
    out_ref[:, half_dim:] = jnp.cos(arg)


def _round_up(a, m):
    return (a + m - 1) // m * m


def _make_freqs(d_denoiser):
    """Host-side (numpy) frequency table, computed once at trace time."""
    half_dim = d_denoiser // 2
    scale = np.float32(math.log(10000.0) / (half_dim - 1))
    return np.exp(np.arange(half_dim, dtype=np.float32) * (-scale)).reshape(
        1, half_dim
    )


def diffusion_embedding(x, d_denoiser, *, block_rows=4096):
    """x: (B,) diffusion steps -> (B, d_denoiser) float32 sinusoidal embedding."""
    assert d_denoiser % 2 == 0, "d_denoiser must be even"
    half_dim = d_denoiser // 2
    assert half_dim > 1, "d_denoiser must be >= 4 (half_dim - 1 appears in a divide)"

    B = x.shape[0]
    freqs = jnp.asarray(_make_freqs(d_denoiser))

    # Real per-row VMEM footprint of one grid step (bytes):
    #   out:  2 buffers * dim * 4         (double-buffered output tile)
    #   x:    2 buffers * 128 * 4         ((TB,1) block is lane-padded to 128)
    #   arg:  half_dim * 4                (temp feeds both sin and cos)
    row_bytes = 2 * d_denoiser * 4 + 2 * 128 * 4 + half_dim * 4
    vmem_budget = 12 << 20  # under scoped defaults on v5e/v6e/v7x
    vmem_rows = max(8, (vmem_budget // row_bytes) // 8 * 8)

    TB = min(block_rows, vmem_rows, _round_up(B, 8))
    # Megacore: keep grid >= 2 when each half-tile still has >= ~1 MiB of
    # output, so both v7x TensorCores get a share of the batch.
    half_rows = _round_up(-(-B // 2), 8)
    if half_rows * d_denoiser * 4 >= (1 << 20):
        TB = min(TB, half_rows)
    TB = max(8, TB)

    x2 = x.astype(jnp.float32).reshape(B, 1)

    return pl.pallas_call(
        _diffusion_embedding_kernel,
        out_shape=jax.ShapeDtypeStruct((B, d_denoiser), jnp.float32),
        grid=(pl.cdiv(B, TB),),
        in_specs=[
            pl.BlockSpec((TB, 1), lambda i: (i, 0)),
            pl.BlockSpec((1, half_dim), lambda i: (0, 0)),
        ],
        out_specs=pl.BlockSpec((TB, d_denoiser), lambda i: (i, 0)),
        compiler_params=pltpu.CompilerParams(
            dimension_semantics=("parallel",),
        ),
    )(x2, freqs)


def _reference(x, d_denoiser):
    # Same PyTorch formula; uses the identical freq table so the comparison
    # isolates the kernel's x*f / sin / cos / concat math.
    freqs = jnp.asarray(_make_freqs(d_denoiser))          # (1, half_dim)
    emb = x.astype(jnp.float32)[:, None] * freqs          # (B, half_dim)
    return jnp.concatenate([jnp.sin(emb), jnp.cos(emb)], axis=-1)


if __name__ == "__main__":
    # DiffusionEmbedding has no learned parameters; only d_denoiser matters.
    d_denoiser = 256  # typical WaveNet residual_channels; lane-dense output

    # Case 1: typical small batch of diffusion step indices.
    B = 16
    key = jax.random.PRNGKey(0)
    x = jax.random.uniform(key, (B,), dtype=jnp.float32, minval=0.0, maxval=1000.0)

    out = jax.block_until_ready(diffusion_embedding(x, d_denoiser))
    ref = _reference(x, d_denoiser)
    assert out.shape == (B, d_denoiser)
    assert out.dtype == jnp.float32
    assert jnp.allclose(out, ref, atol=1e-5, rtol=1e-5), "mismatch vs reference (B=16)"

    # Case 2: ragged batch (not a multiple of 8) -- exercises the pad-free
    # clipped writeback of the boundary block.
    B2 = 13
    x2 = jax.random.uniform(
        jax.random.PRNGKey(1), (B2,), dtype=jnp.float32, minval=0.0, maxval=1000.0
    )
    out2 = jax.block_until_ready(diffusion_embedding(x2, d_denoiser))
    ref2 = _reference(x2, d_denoiser)
    assert out2.shape == (B2, d_denoiser)
    assert jnp.allclose(out2, ref2, atol=1e-5, rtol=1e-5), "mismatch vs reference (B=13)"

    print("KERNEL_OK")
</pallas_src>

<mosaic_0001>
module attributes {stable_mosaic.version = 11 : i64} {
  func.func @_diffusion_embedding_kernel(%arg0: i32, %arg1: memref<16x1xf32, #tpu.memory_space<vmem>>, %arg2: memref<1x128xf32, #tpu.memory_space<vmem>>, %arg3: memref<16x256xf32, #tpu.memory_space<vmem>>) attributes {dimension_semantics = [#tpu.dimension_semantics<parallel>], iteration_bounds = array<i64: 1>, scalar_prefetch = 0 : i64, scratch_operands = 0 : i64, tpu.core_type = #tpu.core_type<tc>, window_params = [{transform_indices = @transform_0, window_bounds = array<i64: 16, 1>}, {pipeline_mode = #tpu.pipeline_mode<synchronous>, transform_indices = @transform_1, window_bounds = array<i64: 1, 128>}, {transform_indices = @transform_2, window_bounds = array<i64: 16, 256>}]} {
    %c0 = arith.constant 0 : index
    %c0_0 = arith.constant 0 : index
    %0 = vector.load %arg1[%c0, %c0_0] : memref<16x1xf32, #tpu.memory_space<vmem>>, vector<16x1xf32>
    %c0_1 = arith.constant 0 : index
    %c0_2 = arith.constant 0 : index
    %1 = vector.load %arg2[%c0_1, %c0_2] : memref<1x128xf32, #tpu.memory_space<vmem>>, vector<1x128xf32>
    %2 = vector.broadcast %0 : vector<16x1xf32> to vector<16x128xf32>
    %3 = vector.broadcast %1 : vector<1x128xf32> to vector<16x128xf32>
    %4 = arith.mulf %2, %3 : vector<16x128xf32>
    %5 = math.sin %4 : vector<16x128xf32>
    %c0_3 = arith.constant 0 : index
    %c0_4 = arith.constant 0 : index
    %6 = vector.load %arg3[%c0_3, %c0_4] : memref<16x256xf32, #tpu.memory_space<vmem>>, vector<16x128xf32>
    tpu.vector_store %arg3[%c0_3, %c0_4], %5 {strides = array<i32>} : memref<16x256xf32, #tpu.memory_space<vmem>>, vector<16x128xf32>,
    %7 = math.cos %4 : vector<16x128xf32>
    %c0_5 = arith.constant 0 : index
    %c128 = arith.constant 128 : index
    %8 = vector.load %arg3[%c0_5, %c128] : memref<16x256xf32, #tpu.memory_space<vmem>>, vector<16x128xf32>
    tpu.vector_store %arg3[%c0_5, %c128], %7 {strides = array<i32>} : memref<16x256xf32, #tpu.memory_space<vmem>>, vector<16x128xf32>,
    return
  }
  func.func @transform_0(%arg0: i32) -> (i32, i32) {
    %c0_i32 = arith.constant 0 : i32
    %c0_i32_0 = arith.constant 0 : i32
    return %arg0, %c0_i32 : i32, i32
  }
  func.func @transform_1(%arg0: i32) -> (i32, i32) {
    %c0_i32 = arith.constant 0 : i32
    %c0_i32_0 = arith.constant 0 : i32
    %c0_i32_1 = arith.constant 0 : i32
    return %c0_i32, %c0_i32_0 : i32, i32
  }
  func.func @transform_2(%arg0: i32) -> (i32, i32) {
    %c0_i32 = arith.constant 0 : i32
    %c0_i32_0 = arith.constant 0 : i32
    return %arg0, %c0_i32 : i32, i32
  }
}

</mosaic_0001>

<bundles_post_ra>
// kernel: tpu_custom_call.1
= control target key start
LH: loop header
LB: loop body
LE: loop exit
PB: predicated region body
PF: predicated region fallthrough
CT: control target
= control target key end

     0   :  { %v535_v1 = vmov 0   ;;  %s641_s0 = inlined_call_operand.vmem [shape: f32[16,1], index: 0, kind: input, shape index: {}]   ;;  %s642_s1 = inlined_call_operand.vmem [shape: f32[1,128], index: 1, kind: input, shape index: {}]   ;;  %s643_s2 = inlined_call_operand.hbm [shape: f32[16,256], index: 2, kind: output, shape index: {}]  }
   0x1   :  { %v12_v0 = vld [vmem:[%s641_s0] sm:$0xff]  ;;  %502 = vset.pattern.permute.xlu0 %v535_v1  ;;  %v13_v2 = vld [vmem:[%s641_s0 + $0x8] sm:$0xff] }
   0x2   :  { %17 = vperm.xlu0 %502, %v12_v0  }
   0x3   :  { %7 = vsyncpa [#allocation3], 0  ;;  %v467_v3 = vld [vmem:[%s642_s1] ss:$0 sm:$0xff]  ;;  %v536_v24 = vmov 683565275  }
   0x4   :  { %v537_v28 = vmov 2475754826   ;;  %v538_v30 = vmov 2131351028   ;;  %v539_v32 = vmov 2102212464  }
   0x5   :  { %v540_v34 = vmov 920167782   ;;  %v541_v41 = vmov 1326507024   ;;  %s542_s0 = smov [#allocation2]  }
   0x6   :  { %22 = vperm.xlu0 %502, %v13_v2   ;;  %s456_s1 = sshll.u32 %s542_s0, 4  ;;  %s457_s1 = int_to_ptr.vmem [resolvable:$true] %s456_s1 }
   0x7   :  { %s511_s15 = scalar_lea.vmem %s457_s1, 512  ;;  %p516_p1 = scmp.lt.s32.totalorder %s457_s1, %s457_s1 }
   0x8   :  { %p512_p0 = scmp.ne.s32.totalorder %s457_s1, %s511_s15  ;;  %p517_p2 = scmp.lt.s32.totalorder %s511_s15, %s511_s15 }
   0xa   :  { %p518_p3 = por %p517_p2, %p516_p1 }
   0xc   :  { %p519_p4 = pnand %p518_p3, %p512_p0 }
  0x81   :  { %v18_v4 = vpop.permute.xlu0 %17 }
  0x82   :  { %v569_v5 = vmul.f32 %v467_v3, %v18_v4 }
  0x84   :  { %v33_v6 = vand.u32 2147483647, %v569_v5  ;;  %v36_v7 = vand.u32 2139095040, %v569_v5  ;;  %vm35_vm14 = vcmp.lt.s32.totalorder %v569_v5, 0 }
  0x85   :  { %v23_v8 = vpop.permute.xlu0 %22 }
  0x86   :  { %v37_v9 = vshrl.u32 %v36_v7, 23  ;;  %v573_v10 = vmul.f32 %v467_v3, %v23_v8  ;;  %v40_v11 = vand.u32 8388607, %v33_v6  ;;  %vm34_vm15 = vcmp.le.f32.partialorder %v33_v6, 0.7853982 }
  0x88   :  { %v468_v12 = vadd.s32 4294967169, %v37_v9  ;;  %v140_v13 = vand.u32 2139095040, %v573_v10  ;;  %v41_v15 = vor.u32 8388608, %v40_v11  ;;  %v137_v17 = vand.u32 2147483647, %v573_v10 }
  0x8a   :  { %v43_v14 = vadd.s32 1, %v468_v12  ;;  %v141_v16 = vshrl.u32 %v140_v13, 23  ;;  %v579_v22 = vshll.u32 %v41_v15, 8  ;;  %v144_v26 = vand.u32 8388607, %v137_v17 }
  0x8c   :  { %vm44_vm0 = vcmp.gt.s32.totalorder %v43_v14, 0  ;;  %v472_v19 = vadd.s32 4294967169, %v141_v16  ;;  %v145_v56 = vor.u32 8388608, %v144_v26 }
  0x8d   :  { %v45_v18 = vsel %vm44_vm0, %v43_v14, 0  ;;  %vm139_vm0 = vcmp.lt.s32.totalorder %v573_v10, 0 }
  0x8e   :  { %v46_v20 = vshrl.u32 %v45_v18, 5  ;;  %v47_v21 = vand.u32 31, %v45_v18  ;;  %v147_v27 = vadd.s32 1, %v472_v19  ;;  %v185_v7 = vshll.u32 %v145_v56, 8 }
  0x90   :  { %v48_v23 = vsub.s32 32, %v47_v21  ;;  %v50_v25 = vshll.u32 %v536_v24, %v47_v21  ;;  %v53_v29 = vshll.u32 %v537_v28, %v47_v21  ;;  %v56_v31 = vshll.u32 %v538_v30, %v47_v21 }
  0x91   :  { %v59_v33 = vshll.u32 %v539_v32, %v47_v21  ;;  %v62_v35 = vshll.u32 %v540_v34, %v47_v21  ;;  %vm65_vm1 = vcmp.lt.s32.totalorder %v46_v20, 1  ;;  %vm67_vm2 = vcmp.lt.s32.totalorder %v46_v20, 3 }
  0x92   :  { %v51_v36 = vshrl.u32 %v537_v28, %v48_v23  ;;  %v54_v37 = vshrl.u32 %v538_v30, %v48_v23  ;;  %v57_v38 = vshrl.u32 %v539_v32, %v48_v23  ;;  %v49_v39 = vshrl.u32 %v536_v24, %v48_v23 }
  0x93   :  { %v60_v40 = vshrl.u32 %v540_v34, %v48_v23  ;;  %v63_v42 = vshrl.u32 %v541_v41, %v48_v23  ;;  %vm148_vm3 = vcmp.gt.s32.totalorder %v147_v27, 0  ;;  %vm68_vm4 = vcmp.lt.s32.totalorder %v46_v20, 4 }
  0x94   :  { %v52_v43 = vor.u32 %v51_v36, %v50_v25  ;;  %v55_v44 = vor.u32 %v54_v37, %v53_v29  ;;  %v58_v45 = vor.u32 %v57_v38, %v56_v31  ;;  %v149_v48 = vsel %vm148_vm3, %v147_v27, 0 }
  0x95   :  { %v61_v46 = vor.u32 %v60_v40, %v59_v33  ;;  %v64_v47 = vor.u32 %v63_v42, %v62_v35  ;;  %vm66_vm5 = vcmp.lt.s32.totalorder %v46_v20, 2  ;;  %v151_v59 = vand.u32 31, %v149_v48 }
  0x96   :  { %v69_v49 = vsel %vm65_vm1, %v49_v39, %v52_v43  ;;  %v70_v50 = vsel %vm68_vm4, %v58_v45, 2102212464  ;;  %v73_v51 = vsel %vm65_vm1, %v52_v43, %v55_v44  ;;  %v77_v52 = vsel %vm65_vm1, %v55_v44, %v58_v45 }
  0x97   :  { %v71_v53 = vsel %vm67_vm2, %v55_v44, %v70_v50  ;;  %v74_v54 = vsel %vm68_vm4, %v61_v46, 920167782  ;;  %v78_v55 = vsel %vm68_vm4, %v64_v47, 1326507024  ;;  %v150_v3 = vshrl.u32 %v149_v48, 5 }
  0x98   :  { %v75_v57 = vsel %vm67_vm2, %v58_v45, %v74_v54  ;;  %v79_v58 = vsel %vm67_vm2, %v61_v46, %v78_v55  ;;  %v72_v60 = vsel %vm66_vm5, %v69_v49, %v71_v53  ;;  %v152_v4 = vsub.s32 32, %v151_v59 }
  0x99   :  { %v76_v61 = vsel %vm66_vm5, %v73_v51, %v75_v57  ;;  %v80_v62 = vsel %vm66_vm5, %v77_v52, %v79_v58  ;;  %v88_v8 = vmul.u32 %v579_v22, %v72_v60  ;;  %v154_v9 = vshll.u32 %v536_v24, %v151_v59 }
  0x9a   :  { %v592_v63 = vmul.u32.u64.low %v579_v22, %v80_v62  ;;  %v593_v0 = vmul.u32.u64.high %v579_v22, %v80_v62, %v592_v63  ;;  %v596_v1 = vmul.u32.u64.low %v579_v22, %v76_v61  ;;  %v597_v2 = vmul.u32.u64.high %v579_v22, %v76_v61, %v596_v1 }
  0x9b   :  { %v157_v11 = vshll.u32 %v537_v28, %v151_v59  ;;  %v160_v12 = vshll.u32 %v538_v30, %v151_v59  ;;  %v155_v13 = vshrl.u32 %v537_v28, %v152_v4  ;;  %v158_v14 = vshrl.u32 %v538_v30, %v152_v4 }
  0x9c   :  { %v161_v15 = vshrl.u32 %v539_v32, %v152_v4  ;;  %v163_v16 = vshll.u32 %v539_v32, %v151_v59  ;;  %vm90_vm6 = vc.u32 %v593_v0, %v596_v1  ;;  %v91_v18 = vadd.s32 1, %v597_v2 }
  0x9d   :  { %v164_v19 = vshrl.u32 %v540_v34, %v152_v4  ;;  %v166_v20 = vshll.u32 %v540_v34, %v151_v59  ;;  %v156_v21 = vor.u32 %v155_v13, %v154_v9  ;;  %v159_v23 = vor.u32 %v158_v14, %v157_v11 }
  0x9e   :  { %v162_v25 = vor.u32 %v161_v15, %v160_v12  ;;  %v167_v26 = vshrl.u32 %v541_v41, %v152_v4  ;;  %v92_v22 = vsel %vm90_vm6, %v91_v18, %v597_v2  ;;  %vm169_vm7 = vcmp.lt.s32.totalorder %v150_v3, 1 }
  0x9f   :  { %v165_v27 = vor.u32 %v164_v19, %v163_v16  ;;  %vm172_vm8 = vcmp.lt.s32.totalorder %v150_v3, 4  ;;  %v93_v28 = vadd.s32 %v92_v22, %v88_v8  ;;  %vm171_vm9 = vcmp.lt.s32.totalorder %v150_v3, 3 }
  0xa0   :  { %v168_v29 = vor.u32 %v167_v26, %v166_v20  ;;  %v174_v30 = vsel %vm172_vm8, %v162_v25, 2102212464  ;;  %v153_v31 = vshrl.u32 %v536_v24, %v152_v4  ;;  %v177_v32 = vsel %vm169_vm7, %v156_v21, %v159_v23 }
  0xa1   :  { %v178_v33 = vsel %vm172_vm8, %v165_v27, 920167782  ;;  %v181_v35 = vsel %vm169_vm7, %v159_v23, %v162_v25  ;;  %v94_v36 = vadd.s32 536870912, %v93_v28  ;;  %vm170_vm10 = vcmp.lt.s32.totalorder %v150_v3, 2 }
  0xa2   :  { %v179_v34 = vsel %vm171_vm9, %v162_v25, %v178_v33  ;;  %v182_v37 = vsel %vm172_vm8, %v168_v29, 1326507024  ;;  %v173_v38 = vsel %vm169_vm7, %v153_v31, %v156_v21  ;;  %v175_v39 = vsel %vm171_vm9, %v159_v23, %v174_v30 }
  0xa3   :  { %v180_v40 = vsel %vm170_vm10, %v177_v32, %v179_v34  ;;  %v183_v41 = vsel %vm171_vm9, %v165_v27, %v182_v37  ;;  %v95_v42 = vshrl.u32 %v94_v36, 30  ;;  %v176_v48 = vsel %vm170_vm10, %v173_v38, %v175_v39 }
  0xa4   :  { %v184_v43 = vsel %vm170_vm10, %v181_v35, %v183_v41  ;;  %v607_v44 = vmul.u32.u64.low %v185_v7, %v180_v40  ;;  %v608_v45 = vmul.u32.u64.high %v185_v7, %v180_v40, %v607_v44  ;;  %v192_v51 = vmul.u32 %v185_v7, %v176_v48 }
  0xa5   :  { %v610_v46 = vmul.u32.u64.low %v185_v7, %v184_v43  ;;  %v611_v47 = vmul.u32.u64.high %v185_v7, %v184_v43, %v610_v46  ;;  %v96_v24 = vshll.u32 %v95_v42, 30  ;;  %v89_v63 = vadd.s32 %v596_v1, %v593_v0 }
  0xa6   :  { %v195_v50 = vadd.s32 1, %v608_v45  ;;  %v119_v21 = vsub.s32 4, %v95_v42  ;;  %vm138_vm1 = vcmp.le.f32.partialorder %v137_v17, 0.7853982  ;;  %vm125_vm8 = vweird.f32 %v569_v5 }
  0xa7   :  { %v97_v49 = vsub.s32 %v93_v28, %v96_v24  ;;  %vm194_vm11 = vc.u32 %v611_v47, %v607_v44  ;;  %v193_v0 = vadd.s32 %v607_v44, %v611_v47 }
  0xa8   :  { %v196_v53 = vsel %vm194_vm11, %v195_v50, %v608_v45  ;;  %v120_v30 = vsel %vm35_vm14, %v119_v21, %v95_v42 }
  0xa9   :  { %v99_v52 = vsub.s32 0, %v97_v49  ;;  %v197_v54 = vadd.s32 %v196_v53, %v192_v51  ;;  %v122_v35 = vsel %vm34_vm15, 0, %v120_v30 }
  0xaa   :  { %v126_v38 = vadd.s32 3, %v122_v35  ;;  %v336_v41 = vand.u32 3, %v122_v35 }
  0xab   :  { %v469_v55 = vmin.u32 %v99_v52, %v97_v49  ;;  %v198_v56 = vadd.s32 536870912, %v197_v54 }
  0xac   :  { %v127_v44 = vand.u32 3, %v126_v38  ;;  %vm341_vm2 = vcmp.eq.s32.totalorder %v336_v41, 2  ;;  %vm338_vm5 = vcmp.eq.s32.totalorder %v336_v41, 0  ;;  %vm337_vm7 = vcmp.lt.s32.totalorder %v336_v41, 2 }
  0xad   :  { %v101_v57 = vclz %v469_v55  ;;  %v199_v58 = vshrl.u32 %v198_v56, 30 }
  0xae   :  { %vm132_vm3 = vcmp.eq.s32.totalorder %v127_v44, 2  ;;  %vm129_vm4 = vcmp.eq.s32.totalorder %v127_v44, 0  ;;  %vm128_vm6 = vcmp.lt.s32.totalorder %v127_v44, 2 }
  0xaf   :  { %v470_v59 = vadd.s32 4294967294, %v101_v57  ;;  %v200_v60 = vshll.u32 %v199_v58, 30  ;;  %v223_v40 = vsub.s32 4, %v199_v58 }
  0xb1   :  { %vm471_vm12 = vcmp.lt.s32.totalorder %v470_v59, 0  ;;  %v201_v62 = vsub.s32 %v197_v54, %v200_v60  ;;  %v224_v42 = vsel %vm139_vm0, %v223_v40, %v199_v58 }
  0xb2   :  { %v104_v61 = vsel %vm471_vm12, 0, %v470_v59 }
  0xb3   :  { %v105_v2 = vsub.s32 32, %v104_v61  ;;  %v109_v3 = vsub.s32 4294967266, %v104_v61  ;;  %v203_v4 = vsub.s32 0, %v201_v62  ;;  %v106_v7 = vshll.u32 %v97_v49, %v104_v61 }
  0xb4   :  { %v226_v49 = vsel %vm138_vm1, 0, %v224_v42 }
  0xb5   :  { %v107_v8 = vshrl.u32 %v89_v63, %v105_v2  ;;  %v110_v9 = vadd.s32 127, %v109_v3  ;;  %v473_v11 = vmin.u32 %v203_v4, %v201_v62  ;;  %v230_v55 = vadd.s32 3, %v226_v49 }
  0xb6   :  { %v439_v59 = vand.u32 3, %v226_v49 }
  0xb7   :  { %v108_v12 = vor.u32 %v107_v8, %v106_v7  ;;  %v111_v13 = vshll.u32 %v110_v9, 23  ;;  %v205_v14 = vclz %v473_v11  ;;  %v231_v58 = vand.u32 3, %v230_v55 }
  0xb8   :  { %vm444_vm10 = vcmp.eq.s32.totalorder %v439_v59, 2  ;;  %vm441_vm12 = vcmp.eq.s32.totalorder %v439_v59, 0 }
  0xb9   :  { %v112_v15 = vor.u32 4788187, %v111_v13  ;;  %v474_v16 = vadd.s32 4294967294, %v205_v14  ;;  %v115_v19 = vcvt.s32.f32 %v108_v12  ;;  %vm236_vm9 = vcmp.eq.s32.totalorder %v231_v58, 2 }
  0xba   :  { %vm233_vm11 = vcmp.eq.s32.totalorder %v231_v58, 0 }
  0xbb   :  { %v113_v18 = vand.u32 2147483647, %v112_v15  ;;  %vm475_vm13 = vcmp.lt.s32.totalorder %v474_v16, 0 }
  0xbc   :  { %v208_v23 = vsel %vm475_vm13, 0, %v474_v16  ;;  %vm232_vm13 = vcmp.lt.s32.totalorder %v231_v58, 2 }
  0xbd   :  { %v116_v20 = vmul.f32 %v115_v19, %v113_v18  ;;  %v209_v1 = vsub.s32 32, %v208_v23  ;;  %v213_v25 = vsub.s32 4294967266, %v208_v23  ;;  %v210_v22 = vshll.u32 %v201_v62, %v208_v23 }
  0xbf   :  { %v117_v26 = vxor.u32 2147483648, %v116_v20  ;;  %v211_v27 = vshrl.u32 %v193_v0, %v209_v1  ;;  %v214_v28 = vadd.s32 127, %v213_v25 }
  0xc1   :  { %v118_v29 = vsel %vm35_vm14, %v117_v26, %v116_v20  ;;  %v212_v32 = vor.u32 %v211_v27, %v210_v22  ;;  %v215_v33 = vshll.u32 %v214_v28, 23  ;;  %vm440_vm14 = vcmp.lt.s32.totalorder %v439_v59, 2 }
  0xc2   :  { %v121_v31 = vsel %vm34_vm15, %v569_v5, %v118_v29  ;;  %vm229_vm15 = vweird.f32 %v573_v10 }
  0xc3   :  { %503 = vcosq.f32 %v121_v31  ;;  %v216_v36 = vor.u32 4788187, %v215_v33  ;;  %v219_v37 = vcvt.s32.f32 %v212_v32 }
  0xc4   :  { %505 = vsinq.f32 %v121_v31 }
  0xc5   :  { %v217_v34 = vand.u32 2147483647, %v216_v36 }
  0xc7   :  { %v220_v39 = vmul.f32 %v219_v37, %v217_v34 }
  0xc9   :  { %v221_v43 = vxor.u32 2147483648, %v220_v39 }
  0xcb   :  { %v222_v6 = vsel %vm139_vm0, %v221_v43, %v220_v39 }
  0xcc   :  { %v225_v46 = vsel %vm138_vm1, %v573_v10, %v222_v6 }
  0xcd   :  { %v504_v45 = vpop.eup %503  ;;  %507 = vcosq.f32 %v225_v46 }
  0xce   :  { %v506_v47 = vpop.eup %505  ;;  %v133_v24 = vxor.u32 2147483648, %v504_v45  ;;  %509 = vsinq.f32 %v225_v46 }
  0xcf   :  { %v130_v48 = vxor.u32 2147483648, %v506_v47 }
  0xd0   :  { %v134_v50 = vsel %vm132_vm3, %v133_v24, %v506_v47  ;;  %v343_v51 = vsel %vm341_vm2, %v133_v24, %v506_v47 }
  0xd1   :  { %v131_v52 = vsel %vm129_vm4, %v504_v45, %v130_v48  ;;  %v340_v17 = vsel %vm338_vm5, %v504_v45, %v130_v48 }
  0xd2   :  { %v135_v53 = vsel %vm128_vm6, %v131_v52, %v134_v50  ;;  %v344_v54 = vsel %vm337_vm7, %v340_v17, %v343_v51 }
  0xd3   :  { %v136_v56 = vsel %vm125_vm8, nan, %v135_v53  ;;  %v345_v57 = vsel %vm125_vm8, nan, %v344_v54 }
  0xd4   :  { %241 = vst [vmem:[#allocation2] sm:$0xff] %v136_v56  ;;  %449 = vst [vmem:[#allocation2 + $0x8] sm:$0xff] %v345_v57 }
  0xd7   :  { %v508_v60 = vpop.eup %507 }
  0xd8   :  { %v510_v61 = vpop.eup %509  ;;  %v237_v62 = vxor.u32 2147483648, %v508_v60 }
  0xd9   :  { %v234_v63 = vxor.u32 2147483648, %v510_v61 }
  0xda   :  { %v238_v2 = vsel %vm236_vm9, %v237_v62, %v510_v61  ;;  %v446_v5 = vsel %vm444_vm10, %v237_v62, %v510_v61 }
  0xdb   :  { %v235_v3 = vsel %vm233_vm11, %v508_v60, %v234_v63  ;;  %v443_v4 = vsel %vm441_vm12, %v508_v60, %v234_v63 }
  0xdc   :  { %v239_v7 = vsel %vm232_vm13, %v235_v3, %v238_v2  ;;  %v447_v8 = vsel %vm440_vm14, %v443_v4, %v446_v5 }
  0xdd   :  { %v240_v9 = vsel %vm229_vm15, nan, %v239_v7  ;;  %v448_v11 = vsel %vm229_vm15, nan, %v447_v8 }
  0xde   :  { %242 = vst [vmem:[#allocation2 + $0x10] sm:$0xff] %v240_v9  ;;  %450 = vst [vmem:[#allocation2 + $0x18] sm:$0xff] %v448_v11 }
  0xdf   :  { %522 = shalt.err (!%p519_p4)
}
  0xe0   :  { %s523_s18 = scalar_lea.hbm %s643_s2, 512 }
  0xe1   :  { %p524_p5 = scmp.ne.s32.totalorder %s643_s2, %s523_s18  ;;  %p527_p6 = scmp.lt.u32.totalorder %s523_s18, %s643_s2 }
  0xe3   :  { %p529_p7 = pnand %p527_p6, %p524_p5 }
  0xe5   :  { %532 = shalt.err (!%p529_p7)
}
  0xe6   :  { %s543_s23 = smov 256   ;;  %s544_s24 = smov 16  }
  0xe7   :  { %462 = dma.vmem_to_hbm [thread:$0]  %s457_s1, 512, %s643_s2, [#allocation3], %s543_s23, %s543_s23, %s544_s24  }
  0xe8   :  { %533 = dma.done.wait [#allocation3], 512  }
  0xe9   :  { %534 = vsyncadd [#allocation3], 4294966784 }
  0xea   :  { %466 = vsyncpa [#allocation3], 1 }

</bundles_post_ra>
